<compile_context>
chip_gen: v7x
topology: tpu7x:2x2x1
jax: 0.10.0
libtpu: 0.0.40
codegen_flags: <defaults>
</compile_context>

<pallas_src>
import math
from functools import partial

import jax
import jax.numpy as jnp
from jax.experimental import pallas as pl
from jax.experimental.pallas import tpu as pltpu


def _round_up(n, m):
    return (n + m - 1) // m * m


def _device_kind():
    try:
        return jax.devices()[0].device_kind.lower()
    except Exception:
        return ""


# -----------------------------------------------------------------------------
# Pallas kernel: out = x + pe, with pe broadcast over the batch lane-slices.
#   x_ref / o_ref : (tile_s, B*D)   -- sublanes = seq rows, lanes = B*D
#   pe_ref        : (tile_s, D)
# -----------------------------------------------------------------------------
def pe_add_kernel(x_ref, pe_ref, o_ref, *, batch):
    pe_row = jnp.tile(pe_ref[...], (1, batch))           # (tile_s, B*D)
    o_ref[...] = (x_ref[...] + pe_row).astype(o_ref.dtype)


def positional_encoding_forward(x, pe):
    """x: (S, B, D), pe: (max_len, 1, D) -> (S, B, D).  Eval-mode forward."""
    S, B, D = x.shape
    max_len = pe.shape[0]
    assert S <= max_len, "sequence longer than positional-encoding table"

    # Free, contiguous views: lane-dense output slab + squeezed pe table.
    x2d = x.reshape(S, B * D)
    pe2d = pe.reshape(max_len, D)

    itemsize = max(jnp.dtype(x.dtype).itemsize, jnp.dtype(pe.dtype).itemsize)
    kind = _device_kind()
    is_v7 = "v7" in kind
    # Live VMEM per grid step: x & out blocks (tile_s, B*D) and the pe block
    # (tile_s, D), each double-buffered by the Pallas pipeline.
    budget = (40 << 20) if is_v7 else (64 << 20)          # v7x: 64 MiB VMEM/TC
    vmem_limit = (48 << 20) if is_v7 else (96 << 20)
    per_row = 2 * itemsize * (2 * B * D + D)

    tile_s = max(8, (budget // per_row) // 8 * 8)         # multiple of 8 rows
    tile_s = min(tile_s, _round_up(S, 8))
    if is_v7 and S > 8 and pl.cdiv(S, tile_s) < 2:
        # Guarantee >=2 grid steps so both v7x TensorCores get work.
        tile_s = max(8, _round_up(pl.cdiv(S, 2), 8))

    grid = (pl.cdiv(S, tile_s),)

    out2d = pl.pallas_call(
        partial(pe_add_kernel, batch=B),
        out_shape=jax.ShapeDtypeStruct((S, B * D), x.dtype),
        grid=grid,
        in_specs=[
            pl.BlockSpec((tile_s, B * D), lambda i: (i, 0)),
            pl.BlockSpec((tile_s, D), lambda i: (i, 0)),
        ],
        out_specs=pl.BlockSpec((tile_s, B * D), lambda i: (i, 0)),
        compiler_params=pltpu.CompilerParams(
            dimension_semantics=("parallel",),
            vmem_limit_bytes=vmem_limit),
    )(x2d, pe2d)
    return out2d.reshape(S, B, D)


# Pure-JAX reference of the same math (correctness check).
def positional_encoding_ref(x, pe):
    S = x.shape[0]
    return x + pe[:S].astype(x.dtype)


# -----------------------------------------------------------------------------
# Buffer construction: mirrors PositionalEncoding.__init__ exactly.
# Cast to the activation dtype ONCE here, never per forward call.
# -----------------------------------------------------------------------------
def make_pe(max_len, d_model, dtype=jnp.float32):
    position = jnp.arange(max_len, dtype=jnp.float32)[:, None]          # (L, 1)
    div_term = jnp.exp(jnp.arange(0, d_model, 2, dtype=jnp.float32)
                       * (-math.log(10000.0) / d_model))                # (D/2,)
    angles = position * div_term                                        # (L, D/2)
    pe = jnp.zeros((max_len, d_model), jnp.float32)
    pe = pe.at[:, 0::2].set(jnp.sin(angles))
    pe = pe.at[:, 1::2].set(jnp.cos(angles))
    # unsqueeze(0).transpose(0, 1)  ->  (max_len, 1, d_model)
    return pe[:, None, :].astype(dtype)


if __name__ == "__main__":
    # Small shapes consistent with the module: d_model=32, seq=16, batch=2.
    d_model, seq_len, batch, max_len = 32, 16, 2, 64

    key = jax.random.PRNGKey(0)
    x = jax.random.normal(key, (seq_len, batch, d_model), jnp.float32)
    pe = make_pe(max_len, d_model, dtype=x.dtype)

    out = positional_encoding_forward(x, pe)
    out = jax.block_until_ready(out)

    ref = positional_encoding_ref(x, pe)
    assert out.shape == (seq_len, batch, d_model)
    assert jnp.allclose(out, ref, atol=1e-6, rtol=1e-6), "mismatch vs reference"

    print("KERNEL_OK")
</pallas_src>

<mosaic_0001>
module attributes {stable_mosaic.version = 11 : i64} {
  func.func @pe_add_kernel(%arg0: i32, %arg1: memref<16x64xf32, #tpu.memory_space<vmem>>, %arg2: memref<16x32xf32, #tpu.memory_space<vmem>>, %arg3: memref<16x64xf32, #tpu.memory_space<vmem>>) attributes {dimension_semantics = [#tpu.dimension_semantics<parallel>], iteration_bounds = array<i64: 1>, scalar_prefetch = 0 : i64, scratch_operands = 0 : i64, tpu.core_type = #tpu.core_type<tc>, window_params = [{transform_indices = @transform_0, window_bounds = array<i64: 16, 64>}, {transform_indices = @transform_1, window_bounds = array<i64: 16, 32>}, {transform_indices = @transform_2, window_bounds = array<i64: 16, 64>}]} {
    %c0 = arith.constant 0 : index
    %c0_0 = arith.constant 0 : index
    %0 = vector.load %arg2[%c0, %c0_0] : memref<16x32xf32, #tpu.memory_space<vmem>>, vector<16x32xf32>
    %1 = tpu.concatenate %0, %0 in 1 : vector<16x32xf32>, vector<16x32xf32> -> vector<16x64xf32>
    %c0_1 = arith.constant 0 : index
    %c0_2 = arith.constant 0 : index
    %2 = vector.load %arg1[%c0_1, %c0_2] : memref<16x64xf32, #tpu.memory_space<vmem>>, vector<16x64xf32>
    %3 = arith.addf %2, %1 : vector<16x64xf32>
    %c0_3 = arith.constant 0 : index
    %c0_4 = arith.constant 0 : index
    %4 = vector.load %arg3[%c0_3, %c0_4] : memref<16x64xf32, #tpu.memory_space<vmem>>, vector<16x64xf32>
    tpu.vector_store %arg3[%c0_3, %c0_4], %3 {strides = array<i32>} : memref<16x64xf32, #tpu.memory_space<vmem>>, vector<16x64xf32>,
    return
  }
  func.func @transform_0(%arg0: i32) -> (i32, i32) {
    %c0_i32 = arith.constant 0 : i32
    %c0_i32_0 = arith.constant 0 : i32
    return %arg0, %c0_i32 : i32, i32
  }
  func.func @transform_1(%arg0: i32) -> (i32, i32) {
    %c0_i32 = arith.constant 0 : i32
    %c0_i32_0 = arith.constant 0 : i32
    return %arg0, %c0_i32 : i32, i32
  }
  func.func @transform_2(%arg0: i32) -> (i32, i32) {
    %c0_i32 = arith.constant 0 : i32
    %c0_i32_0 = arith.constant 0 : i32
    return %arg0, %c0_i32 : i32, i32
  }
}

</mosaic_0001>

<bundles_post_ra>
// kernel: tpu_custom_call.1
= control target key start
LH: loop header
LB: loop body
LE: loop exit
PB: predicated region body
PF: predicated region fallthrough
CT: control target
= control target key end

     0   :  { %7 = vsyncpa [#allocation3], 0  ;;  %s225_s0 = inlined_call_operand.hbm [shape: f32[16,64], index: 0, kind: input, shape index: {}]   ;;  %s226_s1 = inlined_call_operand.hbm [shape: f32[64,32], index: 1, kind: input, shape index: {}]   ;;  %s227_s2 = inlined_call_operand.hbm [shape: f32[16,64], index: 2, kind: output, shape index: {}]  }
   0x1   :  { %8 = vsyncpa [#allocation6], 0 }
   0x2   :  { %9 = vsyncpa [#allocation4], 0  ;;  %s156_s9 = smov [#allocation2]   ;;  %s84_s13 = scalar_lea.hbm %s225_s0, 256 }
   0x3   :  { %s15_s10 = sshll.u32 %s156_s9, 4  ;;  %p85_p0 = scmp.ne.s32.totalorder %s225_s0, %s84_s13  ;;  %s16_s10 = int_to_ptr.vmem [resolvable:$true] %s15_s10 }
   0x4   :  { %p88_p1 = scmp.lt.u32.totalorder %s84_s13, %s225_s0 }
   0x6   :  { %p90_p2 = pnand %p88_p1, %p85_p0 }
   0x8   :  { %93 = shalt.err (!%p90_p2)
}
   0x9   :  { %s94_s18 = scalar_lea.vmem %s16_s10, 256  ;;  %p99_p4 = scmp.lt.s32.totalorder %s16_s10, %s16_s10 }
   0xa   :  { %p95_p3 = scmp.ne.s32.totalorder %s16_s10, %s94_s18  ;;  %p100_p5 = scmp.lt.s32.totalorder %s94_s18, %s94_s18 }
   0xc   :  { %p101_p6 = por %p100_p5, %p99_p4 }
   0xe   :  { %p102_p7 = pnand %p101_p6, %p95_p3 }
  0x10   :  { %105 = shalt.err (!%p102_p7)
}
  0x11   :  { %s157_s19 = smov 128   ;;  %s158_s20 = smov 8  }
  0x12   :  { %21 = dma.hbm_to_vmem [thread:$0]  %s225_s0, 256, %s16_s10, [#allocation3], %s157_s19, %s157_s19, %s158_s20  }
  0x13   :  { %s159_s23 = smov [#allocation5]   ;;  %s106_s27 = scalar_lea.hbm %s226_s1, 256 }
  0x14   :  { %s27_s24 = sshll.u32 %s159_s23, 4  ;;  %p107_p8 = scmp.ne.s32.totalorder %s226_s1, %s106_s27  ;;  %s28_s24 = int_to_ptr.vmem [resolvable:$true] %s27_s24 }
  0x15   :  { %s108_s4 = scalar_lea.hbm %s226_s1, 1024  ;;  %p110_p10 = scmp.lt.u32.totalorder %s106_s27, %s226_s1 }
  0x16   :  { %p109_p9 = scmp.lt.u32.totalorder %s108_s4, %s106_s27 }
  0x18   :  { %p111_p11 = por %p110_p10, %p109_p9 }
  0x1a   :  { %p112_p12 = pnand %p111_p11, %p107_p8 }
  0x1c   :  { %115 = shalt.err (!%p112_p12)
}
  0x1d   :  { %s116_s0 = scalar_lea.vmem %s28_s24, 256  ;;  %p121_p0 = scmp.lt.s32.totalorder %s28_s24, %s28_s24 }
  0x1e   :  { %p117_p13 = scmp.ne.s32.totalorder %s28_s24, %s116_s0  ;;  %p122_p1 = scmp.lt.s32.totalorder %s116_s0, %s116_s0 }
  0x20   :  { %p123_p2 = por %p122_p1, %p121_p0 }
  0x22   :  { %p124_p3 = pnand %p123_p2, %p117_p13 }
  0x24   :  { %127 = shalt.err (!%p124_p3)
}
  0x25   :  { %33 = dma.hbm_to_vmem [thread:$0]  %s226_s1, 256, %s28_s24, [#allocation6], %s157_s19, %s157_s19, %s158_s20  }
  0x26   :  { %150 = dma.done.wait [#allocation3], 256  }
  0x27   :  { %151 = vsyncadd [#allocation3], 4294967040 }
  0x28   :  { %152 = dma.done.wait [#allocation6], 256  }
  0x29   :  { %153 = vsyncadd [#allocation6], 4294967040  ;;  %v40_v0 = vld [vmem:[#allocation5] sm:$0xff]  ;;  %s160_s9 = smov 32   ;;  %v41_v1 = vld [vmem:[#allocation5 + $0x8] sm:$0xff]  ;;  %vm50_vm0 = vcmask 261120  }
  0x2a   :  { %44 = vrot.lane.b32.xlu0 %v40_v0, %s160_s9  ;;  %v53_v2 = vld [vmem:[#allocation2] sm:$0xff]  ;;  %vm57_vm1 = vcmask 523264   ;;  %v54_v6 = vld [vmem:[#allocation2 + $0x8] sm:$0xff]  ;;  %s161_s10 = smov [#allocation7]  }
  0x2b   :  { %s65_s11 = sshll.u32 %s161_s10, 4  ;;  %s66_s11 = int_to_ptr.vmem [resolvable:$true] %s65_s11 }
  0x2c   :  { %s128_s1 = scalar_lea.vmem %s66_s11, 256  ;;  %p133_p5 = scmp.lt.s32.totalorder %s66_s11, %s66_s11 }
  0x2d   :  { %p129_p4 = scmp.ne.s32.totalorder %s66_s11, %s128_s1  ;;  %p134_p6 = scmp.lt.s32.totalorder %s128_s1, %s128_s1 }
  0x2e   :  { %46 = vrot.lane.b32.xlu0 %v41_v1, %s160_s9 }
  0x2f   :  { %p135_p7 = por %p134_p6, %p133_p5 }
  0x31   :  { %p136_p8 = pnand %p135_p7, %p129_p4 }
  0x9c   :  { %v45_v3 = vpop.permute.xlu0 %44 }
  0x9d   :  { %v51_v4 = vsel %vm50_vm0, %v40_v0, %v45_v3 }
  0x9e   :  { %v55_v5 = vadd.f32 %v53_v2, %v51_v4 }
  0xa0   :  { %v47_v7 = vpop.permute.xlu0 %46  ;;  %58 = vst.msk [vmem:[#allocation7] sm:$0xff] %vm57_vm1, %v55_v5 }
  0xa1   :  { %v52_v8 = vsel %vm50_vm0, %v41_v1, %v47_v7 }
  0xa2   :  { %v56_v9 = vadd.f32 %v54_v6, %v52_v8 }
  0xa4   :  { %59 = vst.msk [vmem:[#allocation7 + $0x8] sm:$0xff] %vm57_vm1, %v56_v9 }
  0xa5   :  { %139 = shalt.err (!%p136_p8)
}
  0xa6   :  { %s140_s14 = scalar_lea.hbm %s227_s2, 256 }
  0xa7   :  { %p141_p9 = scmp.ne.s32.totalorder %s227_s2, %s140_s14  ;;  %p144_p10 = scmp.lt.u32.totalorder %s140_s14, %s227_s2 }
  0xa9   :  { %p146_p11 = pnand %p144_p10, %p141_p9 }
  0xab   :  { %149 = shalt.err (!%p146_p11)
}
  0xac   :  { %71 = dma.vmem_to_hbm [thread:$0]  %s66_s11, 256, %s227_s2, [#allocation4], %s157_s19, %s157_s19, %s158_s20  }
  0xad   :  { %154 = dma.done.wait [#allocation4], 256  }
  0xae   :  { %155 = vsyncadd [#allocation4], 4294967040 }
  0xaf   :  { %75 = vsyncpa [#allocation3], 1 }
  0xb0   :  { %76 = vsyncpa [#allocation6], 1 }
  0xb1   :  { %77 = vsyncpa [#allocation4], 1 }

</bundles_post_ra>
